<compile_context>
chip_gen: v7x
topology: tpu7x:2x2x1
jax: 0.10.0
libtpu: 0.0.40
codegen_flags: <defaults>
</compile_context>

<pallas_src>
import jax
import jax.numpy as jnp
from jax.experimental import pallas as pl
from jax.experimental.pallas import tpu as pltpu


# ----------------------------------------------------------------------------
# Standalone forward kernel: temperature = exp(log_temperature)
# ----------------------------------------------------------------------------
def _exp_kernel(log_t_ref, out_ref):
    # log_t_ref: (1,) f32 scalar in SMEM (scalar path only on the input side).
    # out_ref:   (1, 1) f32 tile in VMEM.
    # One scalar->vreg splat + one EUP exp (f32 fast path on all generations).
    out_ref[...] = jnp.exp(jnp.full((1, 1), log_t_ref[0], dtype=out_ref.dtype))


@jax.jit
def optimizable_temperature_forward(log_temperature: jax.Array) -> jax.Array:
    """Equivalent of Optimizable_Temperature.forward(): exp(log_temperature).

    Args:
      log_temperature: shape (1,) float parameter.
    Returns:
      shape (1,) float32 temperature = exp(log_temperature).
    """
    log_t = log_temperature.astype(jnp.float32)
    out_2d = pl.pallas_call(
        _exp_kernel,
        out_shape=jax.ShapeDtypeStruct((1, 1), jnp.float32),
        in_specs=[pl.BlockSpec(memory_space=pltpu.MemorySpace.SMEM)],
        out_specs=pl.BlockSpec((1, 1), lambda: (0, 0)),
        cost_estimate=pl.CostEstimate(
            flops=0, transcendentals=1, bytes_accessed=8
        ),
    )(log_t)
    # reshape fuses into the same jitted executable (no extra device launch).
    return out_2d.reshape(1)


@jax.jit
def optimizable_temperature_forward_fused(log_temperature: jax.Array) -> jax.Array:
    """Recommended production path: let XLA fuse the scalar exp (no custom call)."""
    return jnp.exp(log_temperature.astype(jnp.float32))


# ----------------------------------------------------------------------------
# Consumer-fusion demonstration (review recommendation #1):
# the temperature parameter is passed into the downstream kernel via SMEM and
# exp is computed there "for free" on the EUP; no standalone temperature call.
# ----------------------------------------------------------------------------
def _apply_temperature_kernel(log_t_ref, x_ref, o_ref):
    # log_t_ref: (1,) f32 in SMEM;  x_ref/o_ref: (8, 128) f32 tile in VMEM.
    # exp(-log_T) computed on a single vreg splat (one EUP op), then one VPU
    # multiply over the logits tile: logits / temperature.
    inv_t = jnp.exp(jnp.full(x_ref.shape, -log_t_ref[0], dtype=jnp.float32))
    o_ref[...] = (x_ref[...].astype(jnp.float32) * inv_t).astype(o_ref.dtype)


@jax.jit
def apply_temperature(log_temperature: jax.Array, logits: jax.Array) -> jax.Array:
    """logits / exp(log_temperature), with the exp fused into the consumer kernel."""
    log_t = log_temperature.astype(jnp.float32)
    return pl.pallas_call(
        _apply_temperature_kernel,
        out_shape=jax.ShapeDtypeStruct(logits.shape, logits.dtype),
        in_specs=[
            pl.BlockSpec(memory_space=pltpu.MemorySpace.SMEM),
            pl.BlockSpec(logits.shape, lambda: (0, 0)),
        ],
        out_specs=pl.BlockSpec(logits.shape, lambda: (0, 0)),
    )(log_t, logits)


# ----------------------------------------------------------------------------
# Module mirror
# ----------------------------------------------------------------------------
class OptimizableTemperature:
    """JAX/Pallas mirror of the PyTorch Optimizable_Temperature module."""

    def __init__(self, initial_temperature=None):
        if initial_temperature is not None:
            self.log_temperature = jnp.log(
                jnp.asarray([initial_temperature], dtype=jnp.float32)
            )
        else:
            # torch.zeros([1]) default
            self.log_temperature = jnp.zeros([1], dtype=jnp.float32)

    def __call__(self) -> jax.Array:
        return optimizable_temperature_forward(self.log_temperature)


if __name__ == "__main__":
    # The module has no forward inputs; the only state is the parameter.
    key = jax.random.PRNGKey(0)
    k_temp, k_logits = jax.random.split(key)
    initial_temperature = float(
        jax.random.uniform(k_temp, (), minval=0.5, maxval=3.0)
    )

    # Case 1: explicit initial temperature (parameter = log(initial_temperature)).
    module = OptimizableTemperature(initial_temperature=initial_temperature)
    out = jax.block_until_ready(module())
    expected = jnp.asarray([initial_temperature], dtype=jnp.float32)
    assert out.shape == (1,), out.shape
    assert jnp.allclose(out, expected, rtol=1e-5, atol=1e-6), (out, expected)

    # Pallas path matches the fused XLA path (recommended production path).
    out_fused = jax.block_until_ready(
        optimizable_temperature_forward_fused(module.log_temperature)
    )
    assert jnp.allclose(out, out_fused, rtol=1e-6, atol=1e-7), (out, out_fused)

    # Case 2: default init (zeros) -> exp(0) == 1.
    module_default = OptimizableTemperature()
    out_default = jax.block_until_ready(module_default())
    assert jnp.allclose(out_default, jnp.ones([1], dtype=jnp.float32)), out_default

    # Case 3: consumer-fusion path — exp(log_T) computed inside the kernel
    # that actually uses the temperature (review recommendation #1).
    logits = jax.random.normal(k_logits, (8, 128), dtype=jnp.float32)
    scaled = jax.block_until_ready(
        apply_temperature(module.log_temperature, logits)
    )
    ref = logits / jnp.exp(module.log_temperature.astype(jnp.float32))
    assert scaled.shape == logits.shape, scaled.shape
    assert jnp.allclose(scaled, ref, rtol=1e-5, atol=1e-6)

    print("KERNEL_OK")
</pallas_src>

<mosaic_0001>
module attributes {stable_mosaic.version = 11 : i64} {
  func.func @_exp_kernel(%arg0: memref<1xf32, #tpu.memory_space<smem>>, %arg1: memref<1x1xf32, #tpu.memory_space<vmem>>) attributes {dimension_semantics = [], scalar_prefetch = 0 : i64, scratch_operands = 0 : i64, tpu.core_type = #tpu.core_type<tc>} {
    %c0 = arith.constant 0 : index
    %0 = memref.load %arg0[%c0] : memref<1xf32, #tpu.memory_space<smem>>
    %1 = vector.broadcast %0 : f32 to vector<1x1xf32>
    %2 = math.exp %1 : vector<1x1xf32>
    %c0_0 = arith.constant 0 : index
    %c0_1 = arith.constant 0 : index
    %3 = vector.load %arg1[%c0_0, %c0_1] : memref<1x1xf32, #tpu.memory_space<vmem>>, vector<1x1xf32>
    tpu.vector_store %arg1[%c0_0, %c0_1], %2 {strides = array<i32>} : memref<1x1xf32, #tpu.memory_space<vmem>>, vector<1x1xf32>,
    return
  }
}

</mosaic_0001>

<bundles_post_ra>
// kernel: optimizable_temperature_forward.1
= control target key start
LH: loop header
LB: loop body
LE: loop exit
PB: predicated region body
PF: predicated region fallthrough
CT: control target
= control target key end

     0   :  { %s83_s0 = inlined_call_operand.<no memory space> [shape: f32[1], index: 0, kind: input, shape index: {}]   ;;  %s84_s1 = inlined_call_operand.hbm [shape: f32[1,1], index: 1, kind: output, shape index: {}]  }
   0x1   :  { %v11_v0 = vstv %s83_s0 }
   0x2   :  { %7 = vsyncpa [#allocation4], 0  ;;  %v12_v1 = vmul.f32 1.442695, %v11_v0  ;;  %s57_s8 = smov [#allocation3]   ;;  %vm14_vm0 = vcmask 0  }
   0x3   :  { %s22_s9 = sshll.u32 %s57_s8, 4  ;;  %s23_s9 = int_to_ptr.vmem [resolvable:$true] %s22_s9 }
   0x4   :  { %31 = vpow2.f32 %v12_v1  ;;  %s33_s10 = scalar_lea.vmem %s23_s9, 16  ;;  %s37_s11 = scalar_lea.vmem %s23_s9, 32 }
   0x5   :  { %p34_p0 = scmp.ne.s32.totalorder %s23_s9, %s33_s10  ;;  %p38_p1 = scmp.lt.s32.totalorder %s23_s9, %s23_s9 }
   0x6   :  { %p39_p2 = scmp.lt.s32.totalorder %s37_s11, %s33_s10 }
   0x8   :  { %p40_p3 = por %p39_p2, %p38_p1 }
   0xa   :  { %p41_p4 = pnand %p40_p3, %p34_p0 }
   0xe   :  { %v32_v2 = vpop.eup %31 }
   0xf   :  { %15 = vst.msk [vmem:[#allocation3] sm:$0x1] %vm14_vm0, %v32_v2 }
  0x10   :  { %44 = shalt.err (!%p41_p4)
}
  0x11   :  { %s45_s0 = scalar_lea.hbm %s84_s1, 16 }
  0x12   :  { %p46_p5 = scmp.ne.s32.totalorder %s84_s1, %s45_s0  ;;  %p49_p6 = scmp.lt.u32.totalorder %s45_s0, %s84_s1 }
  0x14   :  { %p51_p7 = pnand %p49_p6, %p46_p5 }
  0x16   :  { %54 = shalt.err (!%p51_p7)
}
  0x17   :  { %25 = dma.vmem_to_hbm [thread:$0]  %s23_s9, 16, %s84_s1, [#allocation4]  }
  0x18   :  { %55 = dma.done.wait [#allocation4], 16  }
  0x19   :  { %56 = vsyncadd [#allocation4], 4294967280 }
  0x1a   :  { %29 = vsyncpa [#allocation4], 1 }

</bundles_post_ra>
